<compile_context>
chip_gen: v6e
topology: v6e:2x2x1
jax: 0.10.0
libtpu: 0.0.40
codegen_flags: <defaults>
</compile_context>

<pallas_src>
import functools
import math
from typing import NamedTuple

import numpy as np
import jax
import jax.numpy as jnp
from jax.experimental import pallas as pl
from jax.experimental.pallas import tpu as pltpu

_LANES = 128


def _sublane_unit(dtype) -> int:
    """Row-packing unit: 8 for 4-byte dtypes, 16 for bf16, 32 for int8/fp8."""
    return max(8, 32 // jnp.dtype(dtype).itemsize)


def _chip_budgets():
    """(per-buffer target bytes, scoped-VMEM limit) tuned per TPU generation."""
    target_block = 4 << 20       # 3 arrays x 2 pipeline buffers -> ~24 MiB
    vmem_limit = 40 << 20        # v7x: 64 MiB physical VMEM per TensorCore
    try:
        info = pltpu.get_tpu_info()
        cap = int(getattr(info, "vmem_capacity_bytes", 64 << 20))
        if cap >= (96 << 20):    # v5e / v6e: 128 MiB physical VMEM
            vmem_limit = 64 << 20
    except Exception:
        pass                     # conservative defaults are safe everywhere
    return target_block, vmem_limit


def _pick_tile(total: int, unit: int, max_tile: int) -> int:
    """Tile length for one axis: a multiple of `unit`, capped at max_tile,
    preferring an exact divisor of `total` (no ragged tail -> no masked vst)."""
    max_tile = max(unit, (max_tile // unit) * unit)
    if total <= max_tile:
        return ((total + unit - 1) // unit) * unit  # whole axis, layout-aligned
    cand = max_tile
    while cand >= unit:
        if total % cand == 0:
            return cand
        cand -= unit
    return max_tile  # no aligned divisor; accept a ragged (masked) tail


def _pe_kernel(x_ref, pe_ref, o_ref, *, scale):
    # Purely element-wise; accumulate in f32, cast on store.
    x = x_ref[...].astype(jnp.float32)
    pe = pe_ref[...].astype(jnp.float32)
    o_ref[...] = (x * scale + pe).astype(o_ref.dtype)


def _pos_enc_d_last(x, pe_2d, scale):
    """d_model already lane-dense (D % 128 == 0).

    x: (B, S, D); pe_2d: the FULL (max_seq_len, D) buffer (no per-call slice).
    Grid = (S_tiles, B); batch is the inner axis so the pe tile (indexed by the
    S axis only) is fetched once per S-tile and reused for the whole batch.
    """
    B, S, D = x.shape
    target_block, vmem_limit = _chip_budgets()
    sub = _sublane_unit(x.dtype)
    max_rows = max(sub, target_block // (D * x.dtype.itemsize))
    ts = _pick_tile(S, sub, max_rows)
    # Megacore / v7x 2-TC: give the parallel grid >= 2 blocks when possible.
    if pl.cdiv(S, ts) * B == 1 and ts >= 2 * sub:
        ts = ((pl.cdiv(S, 2) + sub - 1) // sub) * sub
    grid = (pl.cdiv(S, ts), B)   # s outer, b inner -> pe tile reuse across batch

    kernel = functools.partial(_pe_kernel, scale=scale)
    return pl.pallas_call(
        kernel,
        out_shape=jax.ShapeDtypeStruct((B, S, D), x.dtype),
        grid_spec=pltpu.PrefetchScalarGridSpec(
            num_scalar_prefetch=0,
            grid=grid,
            in_specs=[
                # Squeezed batch dim -> kernel sees clean 2-D (ts, D) tiles.
                # (If a trace shows exposed DMA gaps on v7x, sweep
                #  pipeline_mode=pl.Buffered(3) here.)
                pl.BlockSpec((pl.Squeezed(), ts, D), lambda s, b: (b, s, 0)),
                # Full pe buffer passed in; the grid only indexes its first
                # ~S rows, so no wrapper-side slice/copy is needed.
                pl.BlockSpec((ts, D), lambda s, b: (s, 0)),
            ],
            out_specs=pl.BlockSpec((pl.Squeezed(), ts, D),
                                   lambda s, b: (b, s, 0)),
        ),
        compiler_params=pltpu.CompilerParams(
            dimension_semantics=("parallel", "parallel"),
            vmem_limit_bytes=vmem_limit,
        ),
    )(x, pe_2d)


def _pos_enc_flat(x2d, pe_flat, scale):
    """Small / non-128-multiple d_model: trailing (S, D) collapsed so the last
    axis is lane-dense (unmasked vector stores).

    x2d: (B, C) with C = S*D; pe_flat: FULL (1, max_seq_len*D) buffer — the
    grid only indexes its first ~C columns.  Grid = (C_tiles, B_tiles) with the
    batch axis tiled so large B cannot blow past the VMEM budget.
    """
    B, C = x2d.shape
    target_block, vmem_limit = _chip_budgets()
    sub = _sublane_unit(x2d.dtype)
    itemsize = x2d.dtype.itemsize

    # Lane axis first (the whole point of this path is lane-dense stores).
    max_lanes = max(_LANES, target_block // (sub * itemsize))
    tc = _pick_tile(C, _LANES, max_lanes)
    # Batch (sublane) axis, bounded by the remaining per-buffer budget.
    max_rows = max(sub, target_block // (tc * itemsize))
    tb = B if B <= max_rows else _pick_tile(B, sub, max_rows)

    # Megacore / v7x 2-TC: guarantee >= 2 parallel blocks when the shape allows.
    if pl.cdiv(C, tc) * pl.cdiv(B, tb) == 1 and C > _LANES:
        tc = ((pl.cdiv(C, 2) + _LANES - 1) // _LANES) * _LANES

    grid = (pl.cdiv(C, tc), pl.cdiv(B, tb))   # c outer, b inner -> pe reuse

    kernel = functools.partial(_pe_kernel, scale=scale)
    return pl.pallas_call(
        kernel,
        out_shape=jax.ShapeDtypeStruct((B, C), x2d.dtype),
        grid_spec=pltpu.PrefetchScalarGridSpec(
            num_scalar_prefetch=0,
            grid=grid,
            in_specs=[
                pl.BlockSpec((tb, tc), lambda c, b: (b, c)),
                pl.BlockSpec((1, tc), lambda c, b: (0, c)),
            ],
            out_specs=pl.BlockSpec((tb, tc), lambda c, b: (b, c)),
        ),
        compiler_params=pltpu.CompilerParams(
            dimension_semantics=("parallel", "parallel"),
            vmem_limit_bytes=vmem_limit,
        ),
    )(x2d, pe_flat)


class PositionalEncoderState(NamedTuple):
    d_model: int
    pe_2d: jnp.ndarray    # (max_seq_len, d_model)       f32
    pe_flat: jnp.ndarray  # (1, max_seq_len * d_model)   f32


def init_positional_encoder(d_model: int,
                            max_seq_len: int = 4096) -> PositionalEncoderState:
    """Deterministic PE buffers, matching the PyTorch __init__ double loop.

    Note: the starter code uses exponent 2*(i+1)/d_model for the cos terms
    (vs. the canonical 2*i/d_model); reproduced verbatim.  Both layouts needed
    by the kernel are pre-stored here so the forward never slices/reshapes pe.
    """
    assert d_model % 2 == 0, "PositionalEncoder requires an even d_model"
    pe = np.zeros((max_seq_len, d_model), dtype=np.float32)
    pos = np.arange(max_seq_len, dtype=np.float64)[:, None]           # (L, 1)
    i_even = np.arange(0, d_model, 2, dtype=np.float64)[None, :]      # (1, D/2)
    pe[:, 0::2] = np.sin(pos / np.power(10000.0, 2.0 * i_even / d_model))
    pe[:, 1::2] = np.cos(pos / np.power(10000.0, 2.0 * (i_even + 1.0) / d_model))
    return PositionalEncoderState(
        d_model=d_model,
        pe_2d=jnp.asarray(pe),
        pe_flat=jnp.asarray(pe.reshape(1, -1)),
    )


def positional_encoder(state: PositionalEncoderState,
                       x: jnp.ndarray) -> jnp.ndarray:
    """Forward of PositionalEncoder (eval mode): x * sqrt(d_model) + pe[:, :S]."""
    B, S, D = x.shape
    assert D == state.d_model
    assert S <= state.pe_2d.shape[0]
    scale = math.sqrt(state.d_model)

    if D % _LANES == 0:
        # D already lane-dense: tile the sequence axis, keep D on the lanes.
        return _pos_enc_d_last(x, state.pe_2d, scale)
    # Collapse (S, D) so the last axis is lane-dense; a 32-wide last dim would
    # force masked vst.msk partial stores (worst on v5e's single store slot).
    out = _pos_enc_flat(x.reshape(B, S * D), state.pe_flat, scale)
    return out.reshape(B, S, D)


def positional_encoder_ref(state: PositionalEncoderState, x: jnp.ndarray):
    """Pure-JAX reference for correctness check."""
    S = x.shape[1]
    return x * math.sqrt(state.d_model) + state.pe_2d[None, :S, :]


if __name__ == "__main__":
    MAX_SEQ_LEN = 64
    key = jax.random.PRNGKey(0)

    # Small shapes consistent with the module: (batch, seq_len, d_model).
    # First case is the D=32 flattened lane-dense path (now with a 2-block
    # parallel grid); second exercises the D%128==0 sequence-tiled path.
    cases = [(2, 8, 32), (2, 16, 128)]
    for (B, S, D) in cases:
        key, subkey = jax.random.split(key)
        x = jax.random.normal(subkey, (B, S, D), dtype=jnp.float32)
        state = init_positional_encoder(D, MAX_SEQ_LEN)

        out = jax.block_until_ready(positional_encoder(state, x))
        ref = positional_encoder_ref(state, x)
        np.testing.assert_allclose(np.asarray(out), np.asarray(ref),
                                   rtol=1e-6, atol=1e-6)

    print("KERNEL_OK")
</pallas_src>

<mosaic_0001>
module attributes {stable_mosaic.version = 11 : i64} {
  func.func @_pe_kernel(%arg0: i32, %arg1: i32, %arg2: memref<2x128xf32, #tpu.memory_space<vmem>>, %arg3: memref<1x128xf32, #tpu.memory_space<vmem>>, %arg4: memref<2x128xf32, #tpu.memory_space<vmem>>) attributes {dimension_semantics = [#tpu.dimension_semantics<parallel>, #tpu.dimension_semantics<parallel>], iteration_bounds = array<i64: 2, 1>, scalar_prefetch = 0 : i64, scratch_operands = 0 : i64, tpu.core_type = #tpu.core_type<tc>, window_params = [{transform_indices = @transform_0, window_bounds = array<i64: 2, 128>}, {transform_indices = @transform_1, window_bounds = array<i64: 1, 128>}, {transform_indices = @transform_2, window_bounds = array<i64: 2, 128>}]} {
    %c0 = arith.constant 0 : index
    %c0_0 = arith.constant 0 : index
    %0 = vector.load %arg2[%c0, %c0_0] : memref<2x128xf32, #tpu.memory_space<vmem>>, vector<2x128xf32>
    %c0_1 = arith.constant 0 : index
    %c0_2 = arith.constant 0 : index
    %1 = vector.load %arg3[%c0_1, %c0_2] : memref<1x128xf32, #tpu.memory_space<vmem>>, vector<1x128xf32>
    %cst = arith.constant 5.65685415 : f32
    %2 = vector.broadcast %cst : f32 to vector<2x128xf32>
    %3 = arith.mulf %0, %2 : vector<2x128xf32>
    %4 = vector.broadcast %1 : vector<1x128xf32> to vector<2x128xf32>
    %5 = arith.addf %3, %4 : vector<2x128xf32>
    %c0_3 = arith.constant 0 : index
    %c0_4 = arith.constant 0 : index
    %6 = vector.load %arg4[%c0_3, %c0_4] : memref<2x128xf32, #tpu.memory_space<vmem>>, vector<2x128xf32>
    tpu.vector_store %arg4[%c0_3, %c0_4], %5 {strides = array<i32>} : memref<2x128xf32, #tpu.memory_space<vmem>>, vector<2x128xf32>,
    return
  }
  func.func @transform_0(%arg0: i32, %arg1: i32) -> (i32, i32) {
    %c0_i32 = arith.constant 0 : i32
    return %arg1, %arg0 : i32, i32
  }
  func.func @transform_1(%arg0: i32, %arg1: i32) -> (i32, i32) {
    %c0_i32 = arith.constant 0 : i32
    %c0_i32_0 = arith.constant 0 : i32
    return %c0_i32, %arg0 : i32, i32
  }
  func.func @transform_2(%arg0: i32, %arg1: i32) -> (i32, i32) {
    %c0_i32 = arith.constant 0 : i32
    return %arg1, %arg0 : i32, i32
  }
}

</mosaic_0001>

<bundles_post_ra>
// kernel: tpu_custom_call.1
= control target key start
LH: loop header
LB: loop body
LE: loop exit
PB: predicated region body
PF: predicated region fallthrough
CT: control target
= control target key end

     0   :  { %7 = vsyncpa [#allocation3], 0  ;;  %s746_s0 = inlined_call_operand.hbm [shape: f32[2,256], index: 0, kind: input, shape index: {}]   ;;  %s747_s1 = inlined_call_operand.hbm [shape: f32[1,2048], index: 1, kind: input, shape index: {}]   ;;  %s748_s2 = inlined_call_operand.hbm [shape: f32[2,256], index: 2, kind: output, shape index: {}]  }
   0x1   :  { %9 = vsyncpa [#allocation3 + $0x1], 0 }
   0x2   :  { %10 = vsyncpa [#allocation6], 0 }
   0x3   :  { %12 = vsyncpa [#allocation6 + $0x1], 0 }
   0x4   :  { %13 = vsyncpa [#allocation4], 0 }
   0x5   :  { %15 = vsyncpa [#allocation4 + $0x1], 0  ;;  %s582_s9 = smov 0   ;;  %s584_s10 = smov 0  }
   0x6   :  { %s586_s11 = smov 0   ;;  %s588_s12 = smov 0  }
   0x7   :  { %s590_s13 = smov 0   ;;  %s592_s14 = smov 0  }
   0x8 LB: > { %s340_s15 = sadd.s32 4294967295, %s562_s14   ;;  %s341_s16 = sadd.s32 4294967294, %s562_s14   ;;  %s562_s14 = sphi %s592_s14, %s21_s14   ;;  %s558_s13 = sphi %s590_s13, %s760_s13   ;;  %s554_s12 = sphi %s588_s12, %s759_s12   ;;  %s550_s11 = sphi %s586_s11, %s758_s11   ;;  %s546_s10 = sphi %s584_s10, %s757_s10   ;;  %s542_s9 = sphi %s582_s9, %s756_s9  }
   0x9   : > { %s33_s17 = sadd.s32 1, %s558_s13  ;;  %s42_s18 = sadd.s32 1, %s550_s11 }
   0xa   : > { %p35_p0 = scmp.ge.s32.totalorder %s33_s17, 2  ;;  %p49_p1 = scmp.ne.s32.totalorder %s550_s11, %s546_s10 }
   0xb   : > { %p50_p2 = scmp.eq.s32.totalorder %s562_s14, 0  ;;  %p55_p3 = scmp.ne.s32.totalorder %s546_s10, %s542_s9 }
   0xc   : > { %s762_s17 = smov (%p35_p0, %s33_s17), 0  ;;  %p56_p5 = scmp.eq.s32.totalorder %s340_s15, 0 }
   0xd   : > { %p623_p4 = por %p50_p2, %p49_p1  ;;  %s38_s20 = ssub.s32 %s558_s13, %s762_s17 }
   0xe   : > { %p107_p6 = scmp.eq.s32.totalorder %s340_s15, 1  ;;  %p40_p7 = scmp.eq.s32.totalorder %s38_s20, 0 }
   0xf   : > { %p629_p8 = por %p56_p5, %p55_p3  ;;  %p113_p10 = scmp.eq.s32.totalorder %s341_s16, 1 }
  0x10   : > { %p633_p9 = por %p107_p6, %p49_p1  ;;  %p372_p13 = scmp.lt.s32.totalorder %s562_s14, 2 }
  0x11   : > { %s638_s23 = scalar_select %p40_p7, %s550_s11, %s42_s18  }
  0x12   : > { %p640_p11 = por %p113_p10, %p55_p3  ;;  %s647_s25 = sand.u32 1, %s550_s11  }
  0x13   : > { %s344_s26 = sshll.u32 %s647_s25, 1  ;;  %s345_s27 = sshll.u32 %s558_s13, 5 }
  0x14   : > { %s144_s30 = scalar_lea.hbm %s746_s0, %s345_s27  ;;  %s137_s3 = scalar_lea.vmem [#allocation2], %s344_s26 }
  0x15   : > { %s146_s4 = sshll.u32 %s137_s3, 4  ;;  %p656_p0 = pnand %p372_p13, %p623_p4  ;;  %s147_s4 = int_to_ptr.vmem [resolvable:$true] %s146_s4 }
  0x16   : > { %p347_p1 = scmp.ge.s32.totalorder %s562_s14, 1  ;;  %p168_p2 = scmp.lt.s32.totalorder %s562_s14, 3 }
  0x17   : > { %s134_s6 = scalar_lea.sflag [#allocation3], %s647_s25  ;;  %p424_p3 = pneg %p656_p0 }
  0x18   : > { %s435_s7 = scalar_lea.vmem %s147_s4, 32  ;;  %s564_s8 = smov [#allocation2]  }
  0x19   : > { %p436_p5 = scmp.ne.s32.totalorder %s147_s4, %s435_s7  ;;  %s440_s15 = sshll.u32 %s564_s8, 4  ;;  %s441_s15 = int_to_ptr.vmem [resolvable:$false] %s440_s15 }
  0x1a   : > { %s442_s16 = scalar_lea.vmem %s441_s15, 64  ;;  %p443_p4 = scmp.lt.s32.totalorder %s147_s4, %s441_s15 }
  0x1b   : > { %p438_p6 = pnand %p436_p5, %p424_p3  ;;  %p444_p10 = scmp.lt.s32.totalorder %s442_s16, %s435_s7 }
  0x1d   : > { %p439_p7 = pneg %p438_p6  ;;  %p445_p13 = por %p444_p10, %p443_p4 }
  0x1f   : > { %p446_p12 = pnand %p445_p13, %p439_p7 }
  0x21   : > { %449 = shalt.err (!%p446_p12)
}
  0x22   : > { %364 = dma.hbm_to_vmem [thread:$0]  (!%p656_p0), %s144_s30, 32, %s147_s4, %s134_s6  }
  0x23   : > { %p674_p5 = pnand %p347_p1, %p168_p2  ;;  %s346_s19 = sshll.u32 %s558_s13, 4 }
  0x24   : > { %s156_s20 = scalar_lea.vmem [#allocation5], %s647_s25  ;;  %s161_s29 = scalar_lea.hbm %s747_s1, %s346_s19 }
  0x25   : > { %s163_s26 = sshll.u32 %s156_s20, 4  ;;  %s154_s3 = scalar_lea.sflag [#allocation6], %s647_s25  ;;  %s164_s26 = int_to_ptr.vmem [resolvable:$true] %s163_s26 }
  0x26   : > { %s463_s7 = scalar_lea.vmem %s164_s26, 16  ;;  %s565_s30 = smov [#allocation5]  }
  0x27   : > { %p464_p12 = scmp.ne.s32.totalorder %s164_s26, %s463_s7  ;;  %s468_s4 = sshll.u32 %s565_s30, 4  ;;  %s469_s4 = int_to_ptr.vmem [resolvable:$false] %s468_s4 }
  0x28   : > { %s470_s6 = scalar_lea.vmem %s469_s4, 32  ;;  %p471_p1 = scmp.lt.s32.totalorder %s164_s26, %s469_s4 }
  0x29   : > { %p466_p6 = pnand %p464_p12, %p424_p3  ;;  %p472_p2 = scmp.lt.s32.totalorder %s470_s6, %s463_s7 }
  0x2b   : > { %p467_p7 = pneg %p466_p6  ;;  %p473_p4 = por %p472_p2, %p471_p1 }
  0x2d   : > { %p474_p10 = pnand %p473_p4, %p467_p7 }
  0x2f   : > { %477 = shalt.err (!%p474_p10)
}
  0x30   : > { %367 = dma.hbm_to_vmem [thread:$0]  (!%p656_p0), %s161_s29, 16, %s164_s26, %s154_s3  }
  0x31   : > { %172 = sbr.rel (%p674_p5) target bundleno = 81 (0x51), region = 28  ;;  %s692_s25 = sand.u32 (!%p674_p5), 1, %s546_s10  }
  0x32   : > { %s348_s8 = sshll.u32 (!%p674_p5), %s692_s25, 1  ;;  %s175_s15 = scalar_lea.sflag (!%p674_p5), [#allocation3], %s692_s25 }
  0x33   : > { %s178_s16 = scalar_lea.vmem (!%p674_p5), [#allocation2], %s348_s8 }
  0x36   : > { %529 = dma.done.wait (%p629_p8), %s175_s15, 32  }
  0x37   : > { %531 = vsyncadd (%p629_p8), %s175_s15, 4294967264  ;;  %s184_s5 = scalar_lea.sflag [#allocation6], %s692_s25  ;;  %s186_s18 = scalar_lea.vmem [#allocation5], %s692_s25 }
  0x38   : > { %533 = dma.done.wait (%p629_p8), %s184_s5, 16  }
  0x39   : > { %535 = vsyncadd (%p629_p8), %s184_s5, 4294967280  ;;  %v211_v0 = vld [vmem:[%s178_s16] sm:$0x3]  ;;  %s210_s19 = scalar_lea.vmem [#allocation7], %s348_s8  ;;  %s352_s26 = sshll.u32 %s554_s12, 5 }
  0x3a   : > { %v350_v1 = vld [vmem:[%s186_s18] ss:$0 sm:$0xff]  ;;  %s238_s20 = sshll.u32 %s210_s19, 4  ;;  %v213_v2 = vmul.f32 5.656854, %v211_v0  ;;  %s236_s29 = scalar_lea.hbm %s748_s2, %s352_s26  ;;  %s239_s20 = int_to_ptr.vmem [resolvable:$true] %s238_s20 }
  0x3b   : > { %s223_s3 = scalar_lea.sflag [#allocation4], %s692_s25  ;;  %s478_s7 = scalar_lea.vmem %s239_s20, 32 }
  0x3c   : > { %v220_v3 = vadd.f32 %v350_v1, %v213_v2  ;;  %p479_p0 = scmp.ne.s32.totalorder %s239_s20, %s478_s7  ;;  %s566_s21 = smov [#allocation7]  }
  0x3d   : > { %s482_s30 = sshll.u32 %s566_s21, 4  ;;  %s483_s30 = int_to_ptr.vmem [resolvable:$false] %s482_s30 }
  0x3e   : > { %221 = vst [vmem:[%s210_s19] sm:$0x3] %v220_v3  ;;  %p480_p8 = pnand %p479_p0, %p633_p9  ;;  %s484_s4 = scalar_lea.vmem %s483_s30, 64 }
  0x3f   : > { %p485_p13 = scmp.lt.s32.totalorder %s239_s20, %s483_s30  ;;  %p486_p5 = scmp.lt.s32.totalorder %s484_s4, %s478_s7 }
  0x40   : > { %p481_p3 = pneg %p480_p8 }
  0x41   : > { %p487_p12 = por %p486_p5, %p485_p13 }
  0x43   : > { %p488_p6 = pnand %p487_p12, %p481_p3 }
  0x45   : > { %491 = shalt.err (!%p488_p6)
}
  0x46   : > { %s492_s12 = scalar_lea.hbm %s236_s29, 32  ;;  %s496_s8 = scalar_lea.hbm %s748_s2, 64 }
  0x47   : > { %p493_p7 = scmp.ne.s32.totalorder %s236_s29, %s492_s12  ;;  %p497_p4 = scmp.lt.s32.totalorder %s236_s29, %s748_s2 }
  0x48   : > { %p498_p10 = scmp.lt.s32.totalorder %s496_s8, %s492_s12 }
  0x49   : > { %p494_p1 = pnand %p493_p7, %p633_p9 }
  0x4a   : > { %p499_p0 = por %p498_p10, %p497_p4 }
  0x4b   : > { %p495_p2 = pneg %p494_p1 }
  0x4d   : > { %p500_p8 = pnand %p499_p0, %p495_p2 }
  0x4f   : > { %503 = shalt.err (!%p500_p8)
}
  0x50   : > { %359 = dma.vmem_to_hbm [thread:$0]  (%p633_p9), %s239_s20, 32, %s236_s29, %s223_s3  }
  0x51 PF: > { %s250_s5 = sand.u32 1, %s542_s9   ;;  %p755_p3 = scmp.ge.s32.totalorder %s562_s14, 2 }
  0x52   : > { %s251_s18 = scalar_lea.sflag [#allocation4], %s250_s5 }
  0x53   : > { %p369_p13 = pnand %p755_p3, %p640_p11 }
  0x55   : > { %p370_p5 = pneg %p369_p13 }
  0x57   : > { %537 = dma.done.wait (%p370_p5), %s251_s18, 32  }
  0x58   : > { %539 = vsyncadd (%p370_p5), %s251_s18, 4294967264  ;;  %s21_s14 = sadd.s32 1, %s562_s14   ;;  %s756_s9 = smov %s546_s10 }
  0x59   : > { %p18_p12 = scmp.ge.s32.totalorder %s21_s14, 4   ;;  %s757_s10 = smov %s550_s11 }
  0x5a   : > { %s758_s11 = smov %s638_s23  ;;  %s759_s12 = smov %s558_s13 }
  0x5b   : > { %s760_s13 = smov %s762_s17  ;;  %20 = sbr.rel (!%p18_p12) target bundleno = 8 (0x8), region = 86 }
  0x60   :  { %256 = vsyncpa [#allocation3], 1 }
  0x61   :  { %258 = vsyncpa [#allocation3 + $0x1], 1 }
  0x62   :  { %259 = vsyncpa [#allocation6], 1 }
  0x63   :  { %261 = vsyncpa [#allocation6 + $0x1], 1 }
  0x64   :  { %262 = vsyncpa [#allocation4], 1 }
  0x65   :  { %264 = vsyncpa [#allocation4 + $0x1], 1 }

</bundles_post_ra>
